<compile_context>
chip_gen: v6e
topology: v6e:2x2x1
jax: 0.10.0
libtpu: 0.0.40
codegen_flags: <defaults>
</compile_context>

<pallas_src>
import functools

import jax
import jax.numpy as jnp
from jax.experimental import pallas as pl
from jax.experimental.pallas import tpu as pltpu


def _continuity_loss_kernel(theta_ref, out_ref, carry_ref, acc_ref, *,
                            total_rows: int, scale: float):
    i = pl.program_id(0)
    last = pl.num_programs(0) - 1

    x = theta_ref[...].astype(jnp.float32)          # (TM, Np)
    tm = x.shape[0]

    @pl.when(i == 0)
    def _init():
        acc_ref[0, 0] = jnp.float32(0.0)

    # In-tile first differences via one XLU sublane rotation:
    #   x_next[j] = x[(j + 1) % tm]   (shift = tm - 1  ==  shift of -1)
    x_next = pltpu.roll(x, shift=tm - 1, axis=0)
    d = x_next - x
    # Row j pairs global rows (g, g+1) with g = i*tm + j; valid iff
    # g + 1 < total_rows and j < tm - 1.  This drops the wrap-around row and
    # any garbage rows of a partial edge tile (masked BEFORE squaring, so
    # garbage/NaN rows contribute exactly zero).
    row = jax.lax.broadcasted_iota(jnp.int32, d.shape, 0)
    n_valid = jnp.minimum(tm - 1, (total_rows - 1) - i * tm)
    d = jnp.where(row < n_valid, d, 0.0)
    acc_ref[0, 0] += jnp.sum(d * d)

    # Boundary pair straddling the previous tile (global rows i*tm-1, i*tm).
    @pl.when(i > 0)
    def _boundary():
        bd = x[0:1, :] - carry_ref[...]
        acc_ref[0, 0] += jnp.sum(bd * bd)

    # Carry this tile's last row for the next (sequential) grid step.
    carry_ref[...] = x[tm - 1:tm, :]

    @pl.when(i == last)
    def _finalize():
        out_ref[0, 0] = acc_ref[0, 0] * jnp.float32(scale)


def continuity_loss(theta: jax.Array, weight: float = 1.0,
                    tile_t: int = 1024) -> jax.Array:
    """Pallas TPU implementation of ContinuityLoss.forward.

    theta: (T, N) array (any float dtype); returns a scalar float32.
    """
    assert theta.ndim == 2, "theta must be (T, N)"
    t, n = theta.shape
    if t < 2:
        # torch.mean over an empty diff -> NaN.
        return jnp.float32(float("nan"))

    itemsize = jnp.dtype(theta.dtype).itemsize
    # Sublane packing unit: 8 rows for 32-bit, 16 for 16-bit, 32 for 8-bit.
    sub = max(8, 32 // max(1, itemsize))

    # Lane-dense layout: pad the feature axis to a multiple of 128 with zeros
    # (padded columns diff to exactly zero, so the sum is unaffected).
    n_pad = ((n + 127) // 128) * 128
    # Tiny-T path: zero-pad rows up to one packing unit; the in-kernel row
    # mask (n_valid = t - 1) zeroes all padded pairs, so the result is exact.
    t_pad = t if t >= sub else sub
    if n_pad != n or t_pad != t:
        x = jnp.pad(theta, ((0, t_pad - t), (0, n_pad - n)))
    else:
        x = theta

    # Tile rows: biggest tile that keeps the double-buffered input comfortably
    # under the smallest per-generation scoped-VMEM default (v5e: 16 MiB).
    rows_budget = max(sub, (8 * 1024 * 1024) // (2 * n_pad * itemsize))
    tile_t = max(sub, min(tile_t, (rows_budget // sub) * sub))
    tm = min(tile_t, (t_pad // sub) * sub)           # multiple of `sub`

    grid = (pl.cdiv(t_pad, tm),)
    # Fold weight and 1/denominator into one compile-time scalar (original N!).
    scale = float(weight) / float((t - 1) * n)

    kernel = functools.partial(_continuity_loss_kernel,
                               total_rows=t, scale=scale)
    out = pl.pallas_call(
        kernel,
        out_shape=jax.ShapeDtypeStruct((1, 1), jnp.float32),
        grid_spec=pltpu.PrefetchScalarGridSpec(
            num_scalar_prefetch=0,
            grid=grid,
            in_specs=[pl.BlockSpec((tm, n_pad), lambda i: (i, 0))],
            out_specs=pl.BlockSpec(memory_space=pltpu.SMEM),
            scratch_shapes=[
                pltpu.VMEM((1, n_pad), jnp.float32),   # carry: prev tile last row
                pltpu.SMEM((1, 1), jnp.float32),       # running sum of squares
            ],
        ),
        compiler_params=pltpu.CompilerParams(
            dimension_semantics=("arbitrary",),        # sequential accumulation
        ),
    )(x)
    return out[0, 0]


if __name__ == "__main__":
    key = jax.random.PRNGKey(0)

    # Small but "interesting": T not a multiple of the tile, N < 128 so the
    # wrapper exercises lane padding, multi-tile carry, and a partial edge tile.
    T, N = 50, 32
    theta = jax.random.normal(key, (T, N), dtype=jnp.float32)
    weight = 0.5

    loss = continuity_loss(theta, weight=weight, tile_t=16)
    loss = jax.block_until_ready(loss)

    # Pure-JAX reference (same semantics as the PyTorch module, fp32).
    ref = jnp.mean((theta[1:] - theta[:-1]) ** 2) * weight
    assert jnp.allclose(loss, ref, rtol=1e-5, atol=1e-6), (loss, ref)

    # Single-tile / already lane-aligned path.
    theta2 = jax.random.normal(jax.random.PRNGKey(1), (16, 128), dtype=jnp.float32)
    loss2 = jax.block_until_ready(continuity_loss(theta2, weight=1.0))
    ref2 = jnp.mean((theta2[1:] - theta2[:-1]) ** 2)
    assert jnp.allclose(loss2, ref2, rtol=1e-5, atol=1e-6), (loss2, ref2)

    # Tiny-T path (rows padded up to one sublane packing unit).
    theta3 = jax.random.normal(jax.random.PRNGKey(2), (5, 20), dtype=jnp.float32)
    loss3 = jax.block_until_ready(continuity_loss(theta3, weight=2.0))
    ref3 = jnp.mean((theta3[1:] - theta3[:-1]) ** 2) * 2.0
    assert jnp.allclose(loss3, ref3, rtol=1e-5, atol=1e-6), (loss3, ref3)

    print("KERNEL_OK")
</pallas_src>

<mosaic_0001>
module attributes {stable_mosaic.version = 11 : i64} {
  func.func @_continuity_loss_kernel(%arg0: i32, %arg1: memref<16x128xf32, #tpu.memory_space<vmem>>, %arg2: memref<1x1xf32, #tpu.memory_space<smem>>, %arg3: memref<1x128xf32, #tpu.memory_space<vmem>>, %arg4: memref<1x1xf32, #tpu.memory_space<smem>>) attributes {dimension_semantics = [#tpu.dimension_semantics<arbitrary>], iteration_bounds = array<i64: 4>, scalar_prefetch = 0 : i64, scratch_operands = 2 : i64, tpu.core_type = #tpu.core_type<tc>, window_params = [{transform_indices = @transform_0, window_bounds = array<i64: 16, 128>}, {transform_indices = @transform_1, window_bounds = array<i64: 1, 1>}]} {
    %c0 = arith.constant 0 : index
    %c0_0 = arith.constant 0 : index
    %0 = vector.load %arg1[%c0, %c0_0] : memref<16x128xf32, #tpu.memory_space<vmem>>, vector<16x128xf32>
    %c0_i32 = arith.constant 0 : i32
    %1 = arith.cmpi eq, %arg0, %c0_i32 : i32
    %2 = arith.extui %1 : i1 to i32
    %c0_i32_1 = arith.constant 0 : i32
    %3 = arith.cmpi ne, %2, %c0_i32_1 : i32
    scf.if %3 {
      %cst_13 = arith.constant 0.000000e+00 : f32
      %c0_14 = arith.constant 0 : index
      %c0_15 = arith.constant 0 : index
      %30 = memref.load %arg4[%c0_14, %c0_15] : memref<1x1xf32, #tpu.memory_space<smem>>
      memref.store %cst_13, %arg4[%c0_14, %c0_15] : memref<1x1xf32, #tpu.memory_space<smem>>
    } else {
    }
    %c15_i32 = arith.constant 15 : i32
    %4 = tpu.dynamic_rotate %0 by %c15_i32 dim 0 : vector<16x128xf32>, i32 -> vector<16x128xf32>
    %5 = arith.subf %4, %0 : vector<16x128xf32>
    %6 = tpu.iota {dimensions = array<i32: 0>} : vector<16x128xi32>
    %c16_i32 = arith.constant 16 : i32
    %7 = arith.muli %arg0, %c16_i32 : i32
    %c49_i32 = arith.constant 49 : i32
    %8 = arith.subi %c49_i32, %7 : i32
    %c15_i32_2 = arith.constant 15 : i32
    %9 = arith.minsi %c15_i32_2, %8 : i32
    %10 = vector.broadcast %9 : i32 to vector<16x128xi32>
    %11 = arith.cmpi slt, %6, %10 : vector<16x128xi32>
    %cst = arith.constant 0.000000e+00 : f32
    %12 = vector.broadcast %cst : f32 to vector<16x128xf32>
    %13 = arith.select %11, %5, %12 : vector<16x128xi1>, vector<16x128xf32>
    %c0_3 = arith.constant 0 : index
    %c0_4 = arith.constant 0 : index
    %14 = memref.load %arg4[%c0_3, %c0_4] : memref<1x1xf32, #tpu.memory_space<smem>>
    %15 = arith.mulf %13, %13 : vector<16x128xf32>
    %16 = vector.shape_cast %15 : vector<16x128xf32> to vector<1x16x128xf32>
    %cst_5 = arith.constant dense<0.000000e+00> : vector<1xf32>
    %17 = vector.multi_reduction <add>, %16, %cst_5 [1, 2] : vector<1x16x128xf32> to vector<1xf32>
    %18 = vector.shape_cast %17 : vector<1xf32> to vector<1x1x1xf32>
    %19 = vector.extract %18[0, 0, 0] : f32 from vector<1x1x1xf32>
    %20 = arith.addf %14, %19 : f32
    %c0_6 = arith.constant 0 : index
    %c0_7 = arith.constant 0 : index
    %21 = memref.load %arg4[%c0_6, %c0_7] : memref<1x1xf32, #tpu.memory_space<smem>>
    memref.store %20, %arg4[%c0_6, %c0_7] : memref<1x1xf32, #tpu.memory_space<smem>>
    %c0_i32_8 = arith.constant 0 : i32
    %22 = arith.cmpi sgt, %arg0, %c0_i32_8 : i32
    %23 = arith.extui %22 : i1 to i32
    %c0_i32_9 = arith.constant 0 : i32
    %24 = arith.cmpi ne, %23, %c0_i32_9 : i32
    scf.if %24 {
      %30 = vector.extract_strided_slice %0 {offsets = [0, 0], sizes = [1, 128], strides = [1, 1]} : vector<16x128xf32> to vector<1x128xf32>
      %c0_13 = arith.constant 0 : index
      %c0_14 = arith.constant 0 : index
      %31 = vector.load %arg3[%c0_13, %c0_14] : memref<1x128xf32, #tpu.memory_space<vmem>>, vector<1x128xf32>
      %32 = arith.subf %30, %31 : vector<1x128xf32>
      %c0_15 = arith.constant 0 : index
      %c0_16 = arith.constant 0 : index
      %33 = memref.load %arg4[%c0_15, %c0_16] : memref<1x1xf32, #tpu.memory_space<smem>>
      %34 = arith.mulf %32, %32 : vector<1x128xf32>
      %35 = vector.shape_cast %34 : vector<1x128xf32> to vector<1x1x128xf32>
      %cst_17 = arith.constant dense<0.000000e+00> : vector<1xf32>
      %36 = vector.multi_reduction <add>, %35, %cst_17 [1, 2] : vector<1x1x128xf32> to vector<1xf32>
      %37 = vector.shape_cast %36 : vector<1xf32> to vector<1x1x1xf32>
      %38 = vector.extract %37[0, 0, 0] : f32 from vector<1x1x1xf32>
      %39 = arith.addf %33, %38 : f32
      %c0_18 = arith.constant 0 : index
      %c0_19 = arith.constant 0 : index
      %40 = memref.load %arg4[%c0_18, %c0_19] : memref<1x1xf32, #tpu.memory_space<smem>>
      memref.store %39, %arg4[%c0_18, %c0_19] : memref<1x1xf32, #tpu.memory_space<smem>>
    } else {
    }
    %25 = vector.extract_strided_slice %0 {offsets = [15, 0], sizes = [1, 128], strides = [1, 1]} : vector<16x128xf32> to vector<1x128xf32>
    %c0_10 = arith.constant 0 : index
    %c0_11 = arith.constant 0 : index
    %26 = vector.load %arg3[%c0_10, %c0_11] : memref<1x128xf32, #tpu.memory_space<vmem>>, vector<1x128xf32>
    tpu.vector_store %arg3[%c0_10, %c0_11], %25 {strides = array<i32>} : memref<1x128xf32, #tpu.memory_space<vmem>>, vector<1x128xf32>,
    %c3_i32 = arith.constant 3 : i32
    %27 = arith.cmpi eq, %arg0, %c3_i32 : i32
    %28 = arith.extui %27 : i1 to i32
    %c0_i32_12 = arith.constant 0 : i32
    %29 = arith.cmpi ne, %28, %c0_i32_12 : i32
    scf.if %29 {
      %c0_13 = arith.constant 0 : index
      %c0_14 = arith.constant 0 : index
      %30 = memref.load %arg4[%c0_13, %c0_14] : memref<1x1xf32, #tpu.memory_space<smem>>
      %cst_15 = arith.constant 3.18877544E-4 : f32
      %31 = arith.mulf %30, %cst_15 : f32
      %c0_16 = arith.constant 0 : index
      %c0_17 = arith.constant 0 : index
      %32 = memref.load %arg2[%c0_16, %c0_17] : memref<1x1xf32, #tpu.memory_space<smem>>
      memref.store %31, %arg2[%c0_16, %c0_17] : memref<1x1xf32, #tpu.memory_space<smem>>
    } else {
    }
    return
  }
  func.func @transform_0(%arg0: i32) -> (i32, i32) {
    %c0_i32 = arith.constant 0 : i32
    %c0_i32_0 = arith.constant 0 : i32
    return %arg0, %c0_i32 : i32, i32
  }
  func.func @transform_1(%arg0: i32) -> (i32, i32) {
    %c0_i32 = arith.constant 0 : i32
    %c0_i32_0 = arith.constant 0 : i32
    %c0_i32_1 = arith.constant 0 : i32
    return %c0_i32, %c0_i32_0 : i32, i32
  }
}

</mosaic_0001>

<bundles_post_ra>
// kernel: tpu_custom_call.1
= control target key start
LH: loop header
LB: loop body
LE: loop exit
PB: predicated region body
PF: predicated region fallthrough
CT: control target
= control target key end

     0   :  { %6 = vsyncpa [#allocation5], 0  ;;  %s539_s0 = inlined_call_operand.hbm [shape: f32[50,128], index: 0, kind: input, shape index: {}]   ;;  %s540_s1 = inlined_call_operand.hbm [shape: f32[1,1], index: 1, kind: output, shape index: {}]  }
   0x1   :  { %8 = vsyncpa [#allocation5 + $0x1], 0 }
   0x2   :  { %9 = vsyncpa [#allocation6], 0  ;;  %s428_s6 = smov 0   ;;  %s430_s7 = smov 0  }
   0x3   :  { %s432_s8 = smov 0   ;;  %s434_s9 = smov 0  }
   0x4 LB: > { %s447_s10 = sadd.s32 4294967295, %s411_s9   ;;  %s450_s11 = sadd.s32 1, %s411_s9   ;;  %s411_s9 = sphi %s434_s9, %s545_s9   ;;  %s407_s8 = sphi %s432_s8, %s544_s8   ;;  %s403_s7 = sphi %s430_s7, %s543_s7   ;;  %s399_s6 = sphi %s428_s6, %s542_s6  }
   0x5   : > { %s19_s12 = ssub.s32 %s411_s9, %s450_s11  ;;  %s22_s13 = sadd.s32 1, %s407_s8 }
   0x6   : > { %p20_p0 = scmp.eq.s32.totalorder %s19_s12, 0  ;;  %p29_p1 = scmp.ne.s32.totalorder %s407_s8, %s403_s7 }
   0x7   : > { %p30_p2 = scmp.eq.s32.totalorder %s411_s9, 0  ;;  %p35_p3 = scmp.ne.s32.totalorder %s403_s7, %s399_s6 }
   0x8   : > { %s460_s14 = scalar_select %p20_p0, %s407_s8, %s22_s13  }
   0x9   : > { %p31_p4 = por %p30_p2, %p29_p1  ;;  %p36_p5 = scmp.eq.s32.totalorder %s447_s10, 0 }
   0xa   : > { %p265_p7 = scmp.ge.s32.totalorder %s411_s9, 4 }
   0xb   : > { %p465_p6 = por %p36_p5, %p35_p3 }
   0xc   : > { %76 = sbr.rel (%p265_p7) target bundleno = 49 (0x31), region = 16 }
  0x11   : > { %79 = sbr.rel (!%p31_p4) target bundleno = 49 (0x31), region = 20  ;;  %s80_s16 = sand.u32 (%p31_p4), 1, %s407_s8  }
  0x12   : > { %s267_s17 = sshll.u32 (%p31_p4), %s411_s9, 1  ;;  %s266_s18 = sshll.u32 (%p31_p4), %s80_s16, 4 }
  0x13   : > { %s86_s19 = ssub.s32 (%p31_p4), 7, %s267_s17  ;;  %s475_s22 = scalar_lea.sflag (%p31_p4), [#allocation5], %s80_s16 }
  0x14   : > { %p87_p8 = scmp.lt.s32.totalorder (%p31_p4), %s86_s19, 2  ;;  %s84_s23 = scalar_lea.vmem (%p31_p4), [#allocation4], %s266_s18 }
  0x16   : > { %s547_s19 = smov (!%p87_p8, %s86_s19), 2 }
  0x17   : > { %s472_s20 = sshll.u32 %s547_s19, 7 }
  0x18   : > { %s91_s21 = ssub.s32 256, %s472_s20 }
  0x19   : > { %92 = vsyncadd %s475_s22, %s91_s21  ;;  %p269_p9 = scmp.ne.s32.totalorder %s472_s20, 0  ;;  %s283_s24 = sshll.u32 %s411_s9, 8 }
  0x1a   : > { %s483_s27 = scalar_lea.hbm %s539_s0, %s283_s24  ;;  %s97_s28 = sshll.u32 %s84_s23, 4  ;;  %s485_s28 = int_to_ptr.vmem [resolvable:$true] %s97_s28 }
  0x1b   : > { %s337_s29 = scalar_lea.hbm %s483_s27, %s472_s20  ;;  %s341_s3 = scalar_lea.hbm %s539_s0, 896 }
  0x1c   : > { %p338_p10 = scmp.ne.s32.totalorder %s483_s27, %s337_s29  ;;  %p342_p13 = scmp.lt.s32.totalorder %s483_s27, %s539_s0 }
  0x1d   : > { %p343_p0 = scmp.lt.s32.totalorder %s341_s3, %s337_s29 }
  0x1e   : > { %p339_p11 = pnand %p338_p10, %p269_p9 }
  0x1f   : > { %p344_p1 = por %p343_p0, %p342_p13 }
  0x20   : > { %p340_p12 = pneg %p339_p11 }
  0x22   : > { %p345_p2 = pnand %p344_p1, %p340_p12 }
  0x24   : > { %348 = shalt.err (!%p345_p2)
}
  0x25   : > { %s349_s6 = scalar_lea.vmem %s485_s28, %s472_s20  ;;  %s413_s12 = smov [#allocation4]  }
  0x26   : > { %p350_p3 = scmp.ne.s32.totalorder %s485_s28, %s349_s6  ;;  %s353_s13 = sshll.u32 %s413_s12, 4  ;;  %s354_s13 = int_to_ptr.vmem [resolvable:$false] %s353_s13 }
  0x27   : > { %s355_s16 = scalar_lea.vmem %s354_s13, 512  ;;  %p356_p8 = scmp.lt.s32.totalorder %s485_s28, %s354_s13 }
  0x28   : > { %p351_p4 = pnand %p350_p3, %p269_p9  ;;  %p357_p10 = scmp.lt.s32.totalorder %s355_s16, %s349_s6 }
  0x2a   : > { %p352_p7 = pneg %p351_p4  ;;  %p358_p11 = por %p357_p10, %p356_p8 }
  0x2c   : > { %p359_p13 = pnand %p358_p11, %p352_p7 }
  0x2e   : > { %362 = shalt.err (!%p359_p13)
}
  0x2f   : > { %s414_s17 = smov 128   ;;  %s415_s18 = smov 8  }
  0x30   : > { %103 = dma.hbm_to_vmem [thread:$0]  (%p269_p9), %s483_s27, %s472_s20, %s485_s28, %s475_s22, %s414_s17, %s414_s17, %s415_s18  }
  0x31 PF: > { %p273_p12 = scmp.ge.s32.totalorder %s411_s9, 1  ;;  %p105_p0 = scmp.lt.s32.totalorder %s411_s9, 5 }
  0x33   : > { %p106_p1 = pnand %p273_p12, %p105_p0 }
  0x34   : > { %s111_s19 = sand.u32 (!%p106_p1), 1, %s403_s7  }
  0x35   : > { %109 = sbr.rel (%p106_p1) target bundleno = 497 (0x1f1), region = 24  ;;  %s274_s21 = sshll.u32 (!%p106_p1), %s111_s19, 4 }
  0x36   : > { %s112_s23 = scalar_lea.sflag (!%p106_p1), [#allocation5], %s111_s19  ;;  %s115_s24 = scalar_lea.vmem (!%p106_p1), [#allocation4], %s274_s21 }
  0x3a   : > { %390 = dma.done.wait (%p465_p6), %s112_s23, 256  }
  0x3b   : > { %392 = vsyncadd (%p465_p6), %s112_s23, 4294967040  ;;  %v144_v0 = vlaneseq  ;;  %s416_s20 = smov 0.0   ;;  %s276_s9 = sshll.u32 %s447_s10, 4  ;;  %v134_v3 = vld [vmem:[%s115_s24] sm:$0xff]  ;;  %v135_v4 = vld [vmem:[%s115_s24 + $0x8] sm:$0xff] }
  0x3c   : > { %290 = sst [smem:[#allocation3]] (%p36_p5), %s416_s20  ;;  %s153_s22 = ssub.s32 49, %s276_s9  ;;  %v142_v6 = vrot.slane %v134_v3, 1  ;;  %v143_v7 = vrot.slane %v135_v4, 1 }
  0x3d   : > { %v145_v1 = vshrl.u32 %v144_v0, 7  ;;  %p154_p9 = scmp.lt.s32.totalorder %s153_s22, 15  ;;  %s161_s15 = sld [smem:[#allocation3]] }
  0x3e   : > { %p277_p5 = scmp.le.s32.totalorder %s447_s10, 0 }
  0x3f   : > { %s549_s22 = smov (!%p154_p9, %s153_s22), 15  ;;  %v151_v2 = vadd.s32 8, %v145_v1  ;;  %vm146_vm0 = vcmp.lt.s32.totalorder %v145_v1, 7 }
  0x40   : > { %v156_v5 = vstv %s549_s22  ;;  %v147_v8 = vsel %vm146_vm0, %v142_v6, %v143_v7  ;;  %v148_v9 = vsel %vm146_vm0, %v143_v7, %v142_v6 }
  0x41   : > { %vm157_vm1 = vcmp.lt.s32.totalorder %v145_v1, %v156_v5  ;;  %vm158_vm2 = vcmp.lt.s32.totalorder %v151_v2, %v156_v5  ;;  %v149_v10 = vsub.f32 %v147_v8, %v134_v3  ;;  %v150_v11 = vsub.f32 %v148_v9, %v135_v4 }
  0x43   : > { %v159_v12 = vsel %vm157_vm1, %v149_v10, 0.0  ;;  %v160_v13 = vsel %vm158_vm2, %v150_v11, 0.0 }
  0x44   : > { %v162_v14 = vmul.f32 %v159_v12, %v159_v12  ;;  %v163_v15 = vmul.f32 %v160_v13, %v160_v13 }
  0x46   : > { %v164_v16 = vadd.f32 %v163_v15, %v162_v14 }
  0x48   : > { %165 = vadd.xlane.f32.xlu0 %v164_v16 }
  0xd1   : > { %v166_v17 = vpop.xlane.xlu0 %165 }
  0xd2   : > { %v167_v18 = vrot.slane %v166_v17, 4 }
  0xd4   : > { %v168_v19 = vadd.f32 %v167_v18, %v166_v17 }
  0xd6   : > { %v169_v20 = vrot.slane %v168_v19, 2 }
  0xd8   : > { %v170_v21 = vadd.f32 %v169_v20, %v168_v19 }
  0xda   : > { %v171_v22 = vrot.slane %v170_v21, 1 }
  0xdc   : > { %v172_v23 = vadd.f32 %v171_v22, %v170_v21 }
  0xde   : > { %284 = vpush %v172_v23 }
 0x10e   : > { %180 = sbr.rel (%p277_p5) target bundleno = 484 (0x1e4), region = 36 }
 0x10f   : > { %s285_s25 = spop %284 }
 0x110   : > { %s174_s26 = sadd.f32 %s285_s25, %s161_s15 }
 0x112   : > { %176 = sst [smem:[#allocation3]] %s174_s26 }
 0x113   : > { %v181_v24 = vld [vmem:[#allocation2] sm:$0x1]  ;;  %vm185_vm3 = vcmask 1040384   ;;  %s183_s27 = sld [smem:[#allocation3]] }
 0x114   : > { %v182_v25 = vsub.f32 %v134_v3, %v181_v24 }
 0x116   : > { %v184_v26 = vmul.f32 %v182_v25, %v182_v25 }
 0x118   : > { %v186_v27 = vsel %vm185_vm3, %v184_v26, 0.0 }
 0x119   : > { %187 = vadd.xlane.f32.xlu0 %v186_v27 }
 0x1a2   : > { %v188_v28 = vpop.xlane.xlu0 %187 }
 0x1a3   : > { %v189_v29 = vrot.slane %v188_v28, 4 }
 0x1a5   : > { %v190_v30 = vadd.f32 %v189_v29, %v188_v28 }
 0x1a7   : > { %v191_v31 = vrot.slane %v190_v30, 2 }
 0x1a9   : > { %v192_v32 = vadd.f32 %v191_v31, %v190_v30 }
 0x1ab   : > { %v193_v33 = vrot.slane %v192_v32, 1 }
 0x1ad   : > { %v194_v34 = vadd.f32 %v193_v33, %v192_v32 }
 0x1af   : > { %286 = vpush %v194_v34 }
 0x1e0   : > { %s287_s28 = spop %286 }
 0x1e1   : > { %s196_s29 = sadd.f32 %s287_s28, %s183_s27 }
 0x1e3   : > { %197 = sst [smem:[#allocation3]] %s196_s29 }
 0x1e4 PF: > { %198 = vst [vmem:[#allocation2 - $0x7] sm:$0x80] %v135_v4  ;;  %s203_s30 = sld [smem:[#allocation3]]  ;;  %p298_p6 = scmp.eq.s32.totalorder %s447_s10, 3 }
 0x1e5   : > { %s417_s3 = smov [#allocation7]  }
 0x1ea   : > { %s204_s2 = smul.f32 0.00031887754, %s203_s30 }
 0x1ec   : > { %292 = sst [smem:[#allocation7]] (%p298_p6), %s204_s2 }
 0x1ed   : > { %294 = dma.smem_to_hbm (%p298_p6), %s417_s3, 16, %s540_s1, [#allocation6]  }
 0x1ee   : > { %394 = dma.done.wait (%p298_p6), [#allocation6], 16  }
 0x1ef   : > { %396 = vsyncadd (%p298_p6), [#allocation6], 4294967280 }
 0x1f0   : > { %220 = sfence }
 0x1f1 PF: > { %p12_p2 = scmp.ge.s32.totalorder %s450_s11, 6   ;;  %s542_s6 = smov %s403_s7 }
 0x1f2   : > { %s543_s7 = smov %s407_s8  ;;  %s544_s8 = smov %s460_s14 }
 0x1f3   : > { %s545_s9 = smov %s450_s11  ;;  %14 = sbr.rel (!%p12_p2) target bundleno = 4 (0x4), region = 76 }
 0x1f8   :  { %226 = vsyncpa [#allocation5], 1 }
 0x1f9   :  { %228 = vsyncpa [#allocation5 + $0x1], 1 }
 0x1fa   :  { %229 = vsyncpa [#allocation6], 1 }
 0x1fb   :  { %231 = vsyncpa [#allocation6 + $0x1], 1 }

</bundles_post_ra>
